<compile_context>
chip_gen: v5e
topology: v5e:2x2
jax: 0.10.0
libtpu: 0.0.40
codegen_flags: <defaults>
</compile_context>

<pallas_src>
import functools

import jax
import jax.numpy as jnp
from jax import lax
from jax.experimental import pallas as pl
from jax.experimental.pallas import tpu as pltpu

LOG_SIG_MAX = 2.0
LOG_SIG_MIN = -20.0
LANE = 128       # TPU lane width
SUB = 8          # f32 sublane width (bias slab row stride)
SUB_BF16 = 16    # bf16 sublane packing: batch tile must be a multiple of 16


def _round_up(x, m):
    return ((x + m - 1) // m) * m


def _policy_kernel(n_layers, lane, half, hl, out_w,
                   x_ref, w_ref, b_ref, out_ref):
    """Fused MLP policy forward on one batch tile.

    x_ref   : [TB, lane]                    bf16 (zero-padded features)
    w_ref   : [(n_layers+1)*lane, w_cols]   bf16 packed weight slab
    b_ref   : [(n_layers+1)*SUB,  w_cols]   f32  packed bias slab (row 8*i = layer i)
    out_ref : [TB, out_w]                   f32  mean @ [0,half), log_std @ [hl,hl+half),
                                                 std @ [2*hl, 2*hl+half)
    Head weight columns are packed as: mean -> [0,half), log_std -> [hl,hl+half),
    log_std (duplicate) -> [2*hl, 2*hl+half), so std = exp(clip(.)) lands in place
    with no cross-lane shuffle.
    """
    h = x_ref[...]                                        # bf16

    # Hidden layers: Linear + ReLU (activation_func=F.relu default).
    for i in range(n_layers):
        w = w_ref[i * lane:(i + 1) * lane, 0:lane]        # bf16 [lane, lane]
        b = b_ref[SUB * i:SUB * i + 1, 0:lane]            # f32  [1, lane]
        a = jnp.dot(h, w, preferred_element_type=jnp.float32) + b
        h = jnp.maximum(a, 0.0).astype(jnp.bfloat16)

    # Head layer (last_activation_func=None).
    w = w_ref[n_layers * lane:(n_layers + 1) * lane, 0:out_w]   # bf16 [lane, out_w]
    b = b_ref[SUB * n_layers:SUB * n_layers + 1, 0:out_w]       # f32  [1, out_w]
    raw = jnp.dot(h, w, preferred_element_type=jnp.float32) + b

    lane_idx = lax.broadcasted_iota(jnp.int32, raw.shape, dimension=1)
    clipped = jnp.clip(raw, LOG_SIG_MIN, LOG_SIG_MAX)
    is_logstd_or_std = (lane_idx >= hl) & (lane_idx < 3 * hl)
    vals = jnp.where(is_logstd_or_std, clipped, raw)      # mean | clipped log_std | clipped dup
    is_std = (lane_idx >= 2 * hl) & (lane_idx < 3 * hl)
    out_ref[...] = jnp.where(is_std, jnp.exp(clipped), vals)   # exp on EUP slot


def pack_policy_params(params):
    """Pack all weights into one bf16 slab and all biases into one f32 slab.

    Call ONCE when params change; pass the results into the jitted forward.
    params: list of (W [in, out], b [out]) for n_layers hidden layers + head.
    Returns (w_slab bf16, b_slab f32, cfg dict of static ints).
    """
    n_layers = len(params) - 1
    in_dim = params[0][0].shape[0]
    out_dim = params[-1][0].shape[1]
    assert out_dim % 2 == 0, "output_shape must be even (mean | log_std chunk)"
    half = out_dim // 2

    feat_dims = [w.shape[0] for (w, _) in params]
    lane = _round_up(max(feat_dims), LANE)
    # Compact head layout when mean|log_std|std fit in one 128-lane block.
    hl = half if 3 * half <= LANE else _round_up(half, LANE)
    out_w = _round_up(3 * hl, LANE)
    w_cols = max(lane, out_w)

    w_slab = jnp.zeros(((n_layers + 1) * lane, w_cols), jnp.float32)
    b_slab = jnp.zeros(((n_layers + 1) * SUB, w_cols), jnp.float32)
    for i, (w, b) in enumerate(params):
        w = jnp.asarray(w, jnp.float32)
        b = jnp.reshape(jnp.asarray(b, jnp.float32), (-1,))
        d_in, d_out = w.shape
        r0 = i * lane
        if i < n_layers:
            w_slab = w_slab.at[r0:r0 + d_in, 0:d_out].set(w)
            b_slab = b_slab.at[SUB * i, 0:d_out].set(b)
        else:
            w_mean, w_ls = w[:, :half], w[:, half:]
            b_mean, b_ls = b[:half], b[half:]
            w_slab = w_slab.at[r0:r0 + d_in, 0:half].set(w_mean)
            w_slab = w_slab.at[r0:r0 + d_in, hl:hl + half].set(w_ls)
            w_slab = w_slab.at[r0:r0 + d_in, 2 * hl:2 * hl + half].set(w_ls)  # dup -> std lanes
            b_slab = b_slab.at[SUB * i, 0:half].set(b_mean)
            b_slab = b_slab.at[SUB * i, hl:hl + half].set(b_ls)
            b_slab = b_slab.at[SUB * i, 2 * hl:2 * hl + half].set(b_ls)
    w_slab = w_slab.astype(jnp.bfloat16)
    cfg = dict(n_layers=n_layers, in_dim=in_dim, half=half,
               lane=lane, hl=hl, out_w=out_w)
    return w_slab, b_slab, cfg


@functools.partial(
    jax.jit,
    static_argnames=("n_layers", "in_dim", "half", "lane", "hl", "out_w", "batch_tile"))
def policy_forward(x, w_slab, b_slab, *, n_layers, in_dim, half, lane, hl, out_w,
                   batch_tile=1024):
    """x: [B, in_dim] (any float dtype).  Returns (mean, std, log_std), each [B, half] f32."""
    B = x.shape[0]

    # --- choose batch tile: multiple of 16 (bf16 sublanes), <= batch_tile, and
    # (when the batch allows) <= half the padded batch so the 1-D "parallel"
    # grid has >= 2 steps and both v7x TensorCores get work.
    b16 = _round_up(B, SUB_BF16)
    tb_target = min(_round_up(batch_tile, SUB_BF16), b16)
    if b16 >= 2 * SUB_BF16:
        tb_target = min(tb_target, max(SUB_BF16, b16 // 2))
    g = pl.cdiv(b16, tb_target)                  # grid steps
    tb = _round_up(-(-b16 // g), SUB_BF16)       # ceil(b16/g) rounded to 16 rows
    b_pad = tb * g

    xb = x.astype(jnp.bfloat16)
    if b_pad != B or lane != in_dim:
        xb = jnp.pad(xb, ((0, b_pad - B), (0, lane - in_dim)))

    w_rows, w_cols = w_slab.shape
    b_rows = b_slab.shape[0]
    kernel = functools.partial(_policy_kernel, n_layers, lane, half, hl, out_w)
    out = pl.pallas_call(
        kernel,
        out_shape=jax.ShapeDtypeStruct((b_pad, out_w), jnp.float32),
        grid=(g,),
        in_specs=[
            pl.BlockSpec((tb, lane), lambda i: (i, 0)),
            pl.BlockSpec((w_rows, w_cols), lambda i: (0, 0)),
            pl.BlockSpec((b_rows, w_cols), lambda i: (0, 0)),
        ],
        out_specs=pl.BlockSpec((tb, out_w), lambda i: (i, 0)),
        compiler_params=pltpu.CompilerParams(
            dimension_semantics=("parallel",)),
    )(xb, w_slab, b_slab)

    mean = out[:B, 0:half]
    log_std = out[:B, hl:hl + half]
    std = out[:B, 2 * hl:2 * hl + half]
    return mean, std, log_std


def init_params(key, input_shape, output_shape, hidden_shape, n_layers):
    """Deterministic fan-in uniform init (like torch's default Linear init)."""
    params = []
    dims_in = [input_shape] + [hidden_shape] * n_layers
    dims_out = [hidden_shape] * n_layers + [output_shape]
    for d_in, d_out in zip(dims_in, dims_out):
        key, kw, kb = jax.random.split(key, 3)
        bound = 1.0 / jnp.sqrt(jnp.float32(d_in))
        w = jax.random.uniform(kw, (d_in, d_out), jnp.float32, -bound, bound)
        b = jax.random.uniform(kb, (d_out,), jnp.float32, -bound, bound)
        params.append((w, b))
    return params


def _check(x, params, n_layers, mean, std, log_std):
    # Reference 1: same math, same bf16-matmul/f32-accumulate quantization.
    out = x.astype(jnp.bfloat16)
    for i, (w, b) in enumerate(params):
        out = jnp.dot(out, w.astype(jnp.bfloat16),
                      preferred_element_type=jnp.float32) + b
        if i < n_layers:
            out = jnp.maximum(out, 0.0).astype(jnp.bfloat16)
    ref_mean, ref_log_std = jnp.split(out, 2, axis=-1)
    ref_log_std = jnp.clip(ref_log_std, LOG_SIG_MIN, LOG_SIG_MAX)
    ref_std = jnp.exp(ref_log_std)
    assert jnp.allclose(mean, ref_mean, atol=1e-3, rtol=1e-3)
    assert jnp.allclose(log_std, ref_log_std, atol=1e-3, rtol=1e-3)
    assert jnp.allclose(std, ref_std, atol=1e-3, rtol=1e-3)

    # Reference 2: full-f32 module semantics (looser tol for bf16 matmuls).
    out32 = x
    for i, (w, b) in enumerate(params):
        out32 = out32 @ w + b
        if i < n_layers:
            out32 = jnp.maximum(out32, 0.0)
    r_mean32, r_logstd32 = jnp.split(out32, 2, axis=-1)
    r_logstd32 = jnp.clip(r_logstd32, LOG_SIG_MIN, LOG_SIG_MAX)
    r_std32 = jnp.exp(r_logstd32)
    assert jnp.allclose(mean, r_mean32, atol=5e-2, rtol=5e-2)
    assert jnp.allclose(log_std, r_logstd32, atol=5e-2, rtol=5e-2)
    assert jnp.allclose(std, r_std32, atol=5e-2, rtol=5e-2)


if __name__ == "__main__":
    # Small shapes consistent with the module's forward:
    # batch=8, input_shape=32, hidden_shape=64, n_layers=2 hidden layers,
    # output_shape=16 -> mean/log_std each have 8 dims.
    batch = 8
    input_shape = 32
    hidden_shape = 64
    n_layers = 2
    output_shape = 16

    key = jax.random.PRNGKey(0)
    key, kx, kx2 = jax.random.split(key, 3)
    x = jax.random.normal(kx, (batch, input_shape), jnp.float32)
    params = init_params(key, input_shape, output_shape, hidden_shape, n_layers)

    # Pack once (hoisted out of the per-call forward), reuse across calls.
    w_slab, b_slab, cfg = pack_policy_params(params)

    mean, std, log_std = policy_forward(x, w_slab, b_slab, **cfg)
    jax.block_until_ready((mean, std, log_std))
    _check(x, params, n_layers, mean, std, log_std)

    # Second call with a larger, non-multiple-of-16 batch: exercises padding
    # and a multi-step "parallel" grid (>=2 steps for v7x's two TensorCores).
    x2 = jax.random.normal(kx2, (40, input_shape), jnp.float32)
    mean2, std2, log_std2 = policy_forward(x2, w_slab, b_slab, **cfg)
    jax.block_until_ready((mean2, std2, log_std2))
    _check(x2, params, n_layers, mean2, std2, log_std2)

    # TODO(synk): eval_act/get_action (tanh(mean) + host .numpy()) are host-side
    # conveniences, not part of the kernelized forward.
    print("KERNEL_OK")
</pallas_src>

<mosaic_0001>
module attributes {stable_mosaic.version = 11 : i64} {
  func.func @_policy_kernel(%arg0: i32, %arg1: memref<16x128xbf16, #tpu.memory_space<vmem>>, %arg2: memref<384x128xbf16, #tpu.memory_space<vmem>>, %arg3: memref<24x128xf32, #tpu.memory_space<vmem>>, %arg4: memref<16x128xf32, #tpu.memory_space<vmem>>) attributes {dimension_semantics = [#tpu.dimension_semantics<parallel>], iteration_bounds = array<i64: 1>, scalar_prefetch = 0 : i64, scratch_operands = 0 : i64, tpu.core_type = #tpu.core_type<tc>, window_params = [{transform_indices = @transform_0, window_bounds = array<i64: 16, 128>}, {pipeline_mode = #tpu.pipeline_mode<synchronous>, transform_indices = @transform_1, window_bounds = array<i64: 384, 128>}, {pipeline_mode = #tpu.pipeline_mode<synchronous>, transform_indices = @transform_2, window_bounds = array<i64: 24, 128>}, {transform_indices = @transform_3, window_bounds = array<i64: 16, 128>}]} {
    %c0 = arith.constant 0 : index
    %c0_0 = arith.constant 0 : index
    %0 = vector.load %arg1[%c0, %c0_0] : memref<16x128xbf16, #tpu.memory_space<vmem>>, vector<16x128xbf16>
    %c0_1 = arith.constant 0 : index
    %c0_2 = arith.constant 0 : index
    %1 = vector.load %arg2[%c0_1, %c0_2] : memref<384x128xbf16, #tpu.memory_space<vmem>>, vector<128x128xbf16>
    %c0_3 = arith.constant 0 : index
    %c0_4 = arith.constant 0 : index
    %2 = vector.load %arg3[%c0_3, %c0_4] : memref<24x128xf32, #tpu.memory_space<vmem>>, vector<1x128xf32>
    %cst = arith.constant dense<0.000000e+00> : vector<16x128xf32>
    %3 = tpu.matmul %0, %1, %cst {dimension_numbers = #tpu.dot_dimension_numbers<[1], [0], [0], [1], [0, 0, 1, 1], [], []>} : vector<16x128xbf16>, vector<128x128xbf16>, vector<16x128xf32> -> vector<16x128xf32>
    %4 = vector.broadcast %2 : vector<1x128xf32> to vector<16x128xf32>
    %5 = arith.addf %3, %4 : vector<16x128xf32>
    %cst_5 = arith.constant 0.000000e+00 : f32
    %6 = vector.broadcast %cst_5 : f32 to vector<16x128xf32>
    %7 = arith.maximumf %5, %6 : vector<16x128xf32>
    %8 = arith.truncf %7 : vector<16x128xf32> to vector<16x128xbf16>
    %c128 = arith.constant 128 : index
    %c0_6 = arith.constant 0 : index
    %9 = vector.load %arg2[%c128, %c0_6] : memref<384x128xbf16, #tpu.memory_space<vmem>>, vector<128x128xbf16>
    %c8 = arith.constant 8 : index
    %c0_7 = arith.constant 0 : index
    %10 = vector.load %arg3[%c8, %c0_7] : memref<24x128xf32, #tpu.memory_space<vmem>>, vector<1x128xf32>
    %cst_8 = arith.constant dense<0.000000e+00> : vector<16x128xf32>
    %11 = tpu.matmul %8, %9, %cst_8 {dimension_numbers = #tpu.dot_dimension_numbers<[1], [0], [0], [1], [0, 0, 1, 1], [], []>} : vector<16x128xbf16>, vector<128x128xbf16>, vector<16x128xf32> -> vector<16x128xf32>
    %12 = vector.broadcast %10 : vector<1x128xf32> to vector<16x128xf32>
    %13 = arith.addf %11, %12 : vector<16x128xf32>
    %cst_9 = arith.constant 0.000000e+00 : f32
    %14 = vector.broadcast %cst_9 : f32 to vector<16x128xf32>
    %15 = arith.maximumf %13, %14 : vector<16x128xf32>
    %16 = arith.truncf %15 : vector<16x128xf32> to vector<16x128xbf16>
    %c256 = arith.constant 256 : index
    %c0_10 = arith.constant 0 : index
    %17 = vector.load %arg2[%c256, %c0_10] : memref<384x128xbf16, #tpu.memory_space<vmem>>, vector<128x128xbf16>
    %c16 = arith.constant 16 : index
    %c0_11 = arith.constant 0 : index
    %18 = vector.load %arg3[%c16, %c0_11] : memref<24x128xf32, #tpu.memory_space<vmem>>, vector<1x128xf32>
    %cst_12 = arith.constant dense<0.000000e+00> : vector<16x128xf32>
    %19 = tpu.matmul %16, %17, %cst_12 {dimension_numbers = #tpu.dot_dimension_numbers<[1], [0], [0], [1], [0, 0, 1, 1], [], []>} : vector<16x128xbf16>, vector<128x128xbf16>, vector<16x128xf32> -> vector<16x128xf32>
    %20 = vector.broadcast %18 : vector<1x128xf32> to vector<16x128xf32>
    %21 = arith.addf %19, %20 : vector<16x128xf32>
    %22 = tpu.iota {dimensions = array<i32: 1>} : vector<16x128xi32>
    %cst_13 = arith.constant -2.000000e+01 : f32
    %cst_14 = arith.constant 2.000000e+00 : f32
    %23 = vector.broadcast %cst_13 : f32 to vector<16x128xf32>
    %24 = arith.maximumf %23, %21 : vector<16x128xf32>
    %25 = vector.broadcast %cst_14 : f32 to vector<16x128xf32>
    %26 = arith.minimumf %25, %24 : vector<16x128xf32>
    %c8_i32 = arith.constant 8 : i32
    %27 = vector.broadcast %c8_i32 : i32 to vector<16x128xi32>
    %28 = arith.cmpi sge, %22, %27 : vector<16x128xi32>
    %c24_i32 = arith.constant 24 : i32
    %29 = vector.broadcast %c24_i32 : i32 to vector<16x128xi32>
    %30 = arith.cmpi slt, %22, %29 : vector<16x128xi32>
    %31 = arith.andi %28, %30 : vector<16x128xi1>
    %32 = arith.select %31, %26, %21 : vector<16x128xi1>, vector<16x128xf32>
    %c16_i32 = arith.constant 16 : i32
    %33 = vector.broadcast %c16_i32 : i32 to vector<16x128xi32>
    %34 = arith.cmpi sge, %22, %33 : vector<16x128xi32>
    %c24_i32_15 = arith.constant 24 : i32
    %35 = vector.broadcast %c24_i32_15 : i32 to vector<16x128xi32>
    %36 = arith.cmpi slt, %22, %35 : vector<16x128xi32>
    %37 = arith.andi %34, %36 : vector<16x128xi1>
    %38 = math.exp %26 : vector<16x128xf32>
    %39 = arith.select %37, %38, %32 : vector<16x128xi1>, vector<16x128xf32>
    %c0_16 = arith.constant 0 : index
    %c0_17 = arith.constant 0 : index
    %40 = vector.load %arg4[%c0_16, %c0_17] : memref<16x128xf32, #tpu.memory_space<vmem>>, vector<16x128xf32>
    tpu.vector_store %arg4[%c0_16, %c0_17], %39 {strides = array<i32>} : memref<16x128xf32, #tpu.memory_space<vmem>>, vector<16x128xf32>,
    return
  }
  func.func @transform_0(%arg0: i32) -> (i32, i32) {
    %c0_i32 = arith.constant 0 : i32
    %c0_i32_0 = arith.constant 0 : i32
    return %arg0, %c0_i32 : i32, i32
  }
  func.func @transform_1(%arg0: i32) -> (i32, i32) {
    %c0_i32 = arith.constant 0 : i32
    %c0_i32_0 = arith.constant 0 : i32
    %c0_i32_1 = arith.constant 0 : i32
    return %c0_i32, %c0_i32_0 : i32, i32
  }
  func.func @transform_2(%arg0: i32) -> (i32, i32) {
    %c0_i32 = arith.constant 0 : i32
    %c0_i32_0 = arith.constant 0 : i32
    %c0_i32_1 = arith.constant 0 : i32
    return %c0_i32, %c0_i32_0 : i32, i32
  }
  func.func @transform_3(%arg0: i32) -> (i32, i32) {
    %c0_i32 = arith.constant 0 : i32
    %c0_i32_0 = arith.constant 0 : i32
    return %arg0, %c0_i32 : i32, i32
  }
}

</mosaic_0001>

<bundles_post_ra>
// kernel: policy_forward.1
= control target key start
LH: loop header
LB: loop body
LE: loop exit
PB: predicated region body
PF: predicated region fallthrough
CT: control target
= control target key end

     0   :  { %8 = vsyncpa [#allocation3], 0  ;;  %s471_s15 = smov [#allocation2]   ;;  %s472_s17 = smov 64   ;;  %s515_s0 = inlined_call_operand.vmem [shape: bf16[16,128], index: 0, kind: input, shape index: {}]   ;;  %s516_s1 = inlined_call_operand.hbm [shape: bf16[384,128], index: 1, kind: input, shape index: {}]   ;;  %s517_s2 = inlined_call_operand.vmem [shape: f32[24,128], index: 2, kind: input, shape index: {}]   ;;  %s518_s3 = inlined_call_operand.vmem [shape: f32[16,128], index: 3, kind: output, shape index: {}]  }
   0x1   :  { %s15_s14 = sshll.u32 %s516_s1, 4  ;;  %s17_s16 = sshll.u32 %s471_s15, 4  ;;  %s16_s14 = int_to_ptr.hbm [resolvable:$true] %s15_s14  ;;  %s18_s16 = int_to_ptr.vmem [resolvable:$true] %s17_s16 }
   0x2   :  { %s473_s18 = smov 4  }
   0x3   :  { %23 = dma.hbm_to_vmem [thread:$0]  %s16_s14, 3072, %s18_s16, [#allocation3], %s472_s17, %s472_s17, %s473_s18  }
   0x4   :  { %469 = dma.done.wait [#allocation3], 3072  }
   0x5   :  { %470 = vsyncadd [#allocation3], 4294964224  ;;  %v418_v0 = vld [vmem:[#allocation2 + $0x38] sm:$0xff]  ;;  %v417_v1 = vld [vmem:[#allocation2 + $0x30] sm:$0xff]  ;;  %v284_v44 = vlaneseq }
   0x6   :  { %104 = vmatpush.bf16.msra.mxu0 %v418_v0  ;;  %v426_v2 = vld [vmem:[#allocation2 + $0x78] sm:$0xff]  ;;  %v425_v3 = vld [vmem:[#allocation2 + $0x70] sm:$0xff]  ;;  %v416_v4 = vld [vmem:[#allocation2 + $0x28] sm:$0xff] }
   0x7   :  { %187 = vmatpush.bf16.msra.mxu1 %v426_v2  ;;  %v424_v5 = vld [vmem:[#allocation2 + $0x68] sm:$0xff]  ;;  %v415_v6 = vld [vmem:[#allocation2 + $0x20] sm:$0xff]  ;;  %v414_v8 = vld [vmem:[#allocation2 + $0x18] sm:$0xff]  ;;  %v285_v46 = vand.u32 127, %v284_v44 }
   0x8   :  { %v423_v7 = vld [vmem:[#allocation2 + $0x60] sm:$0xff]  ;;  %v413_v9 = vld [vmem:[#allocation2 + $0x10] sm:$0xff]  ;;  %v412_v10 = vld [vmem:[#allocation2 + $0x8] sm:$0xff] }
   0x9   :  { %v411_v11 = vld [vmem:[#allocation2] sm:$0xff]  ;;  %v422_v13 = vld [vmem:[#allocation2 + $0x58] sm:$0xff]  ;;  %v421_v14 = vld [vmem:[#allocation2 + $0x50] sm:$0xff]  ;;  %vm290_vm0 = vcmp.ge.s32.totalorder %v285_v46, 8  ;;  %vm291_vm1 = vcmp.lt.s32.totalorder %v285_v46, 24  ;;  %vm295_vm2 = vcmp.ge.s32.totalorder %v285_v46, 16 }
   0xa   :  { %105 = vmatpush.bf16.msra.mxu0 %v417_v1  ;;  %v410_v12 = vld [vmem:[%s515_s0] sm:$0xff]  ;;  %v420_v15 = vld [vmem:[#allocation2 + $0x48] sm:$0xff]  ;;  %v434_v17 = vld [vmem:[#allocation2 + $0xb8] sm:$0xff] }
   0xb   :  { %188 = vmatpush.bf16.msra.mxu1 %v425_v3  ;;  %v419_v16 = vld [vmem:[#allocation2 + $0x40] sm:$0xff]  ;;  %270 = vmatpush.bf16.msra.mxu2 %v434_v17  ;;  %v433_v18 = vld [vmem:[#allocation2 + $0xb0] sm:$0xff]  ;;  %v432_v19 = vld [vmem:[#allocation2 + $0xa8] sm:$0xff] }
   0xc   :  { %v431_v20 = vld [vmem:[#allocation2 + $0xa0] sm:$0xff]  ;;  %v430_v29 = vld [vmem:[#allocation2 + $0x98] sm:$0xff]  ;;  %v429_v30 = vld [vmem:[#allocation2 + $0x90] sm:$0xff] }
   0xd   :  { %v438_v22 = vld [vmem:[%s517_s2] ss:$0 sm:$0xff]  ;;  %v428_v31 = vld [vmem:[#allocation2 + $0x88] sm:$0xff]  ;;  %v440_v41 = vld [vmem:[%s517_s2 + $0x10] ss:$0 sm:$0xff] }
   0xe   :  { %106 = vmatpush.bf16.msra.mxu0 %v416_v4  ;;  %v427_v32 = vld [vmem:[#allocation2 + $0x80] sm:$0xff]  ;;  %v439_v34 = vld [vmem:[%s517_s2 + $0x8] ss:$0 sm:$0xff]  ;;  %vm292_vm3 = vmand %vm290_vm0, %vm291_vm1 }
   0xf   :  { %189 = vmatpush.bf16.msra.mxu1 %v424_v5  ;;  %271 = vmatpush.bf16.msra.mxu2 %v433_v18  ;;  %vm296_vm4 = vmand %vm295_vm2, %vm291_vm1 }
  0x12   :  { %107 = vmatpush.bf16.msra.mxu0 %v415_v6 }
  0x13   :  { %190 = vmatpush.bf16.msra.mxu1 %v423_v7  ;;  %272 = vmatpush.bf16.msra.mxu2 %v432_v19 }
  0x16   :  { %108 = vmatpush.bf16.msra.mxu0 %v414_v8 }
  0x17   :  { %191 = vmatpush.bf16.msra.mxu1 %v422_v13  ;;  %273 = vmatpush.bf16.msra.mxu2 %v431_v20 }
  0x1a   :  { %109 = vmatpush.bf16.msra.mxu0 %v413_v9 }
  0x1b   :  { %192 = vmatpush.bf16.msra.mxu1 %v421_v14  ;;  %274 = vmatpush.bf16.msra.mxu2 %v430_v29 }
  0x1e   :  { %110 = vmatpush.bf16.msra.mxu0 %v412_v10 }
  0x1f   :  { %193 = vmatpush.bf16.msra.mxu1 %v420_v15  ;;  %275 = vmatpush.bf16.msra.mxu2 %v429_v30 }
  0x22   :  { %111 = vmatpush.bf16.msra.mxu0 %v411_v11 }
  0x23   :  { %194 = vmatpush.bf16.msra.mxu1 %v419_v16  ;;  %276 = vmatpush.bf16.msra.mxu2 %v428_v31 }
  0x25   :  { %112 = vmatmul.bf16.vlgmr.msra.gmra.mxu0 %v410_v12 }
  0x27   :  { %277 = vmatpush.bf16.msra.mxu2 %v427_v32 }
  0xa2   :  { %v113_v21 = vpop.f32.mrf.mxu0 }
  0xa3   :  { %v114_v23 = vadd.f32 %v438_v22, %v113_v21 }
  0xa5   :  { %v118_v26 = vmax.f32 %v114_v23, 0.0 }
  0xaa   :  { %v115_v24 = vpop.f32.mrf.mxu0 }
  0xab   :  { %v116_v25 = vadd.f32 %v438_v22, %v115_v24 }
  0xad   :  { %v119_v27 = vmax.f32 %v116_v25, 0.0 }
  0xaf   :  { %v120_v28 = vpack.c.bf16 %v119_v27, %v118_v26 }
  0xb1   :  { %195 = vmatmul.bf16.vlgmr.msra.gmra.mxu1 %v120_v28 }
 0x12e   :  { %v196_v33 = vpop.f32.mrf.mxu1 }
 0x12f   :  { %v197_v35 = vadd.f32 %v439_v34, %v196_v33 }
 0x131   :  { %v201_v38 = vmax.f32 %v197_v35, 0.0 }
 0x136   :  { %v198_v36 = vpop.f32.mrf.mxu1 }
 0x137   :  { %v199_v37 = vadd.f32 %v439_v34, %v198_v36 }
 0x139   :  { %v202_v39 = vmax.f32 %v199_v37, 0.0 }
 0x13b   :  { %v203_v40 = vpack.c.bf16 %v202_v39, %v201_v38 }
 0x13d   :  { %278 = vmatmul.bf16.vlgmr.msra.gmra.mxu2 %v203_v40 }
 0x1c0   :  { %v279_v42 = vpop.f32.mrf.mxu2 }
 0x1c1   :  { %v280_v43 = vadd.f32 %v440_v41, %v279_v42 }
 0x1c3   :  { %v286_v45 = vmax.f32 %v280_v43, -20.0 }
 0x1c5   :  { %v288_v47 = vmin.f32 %v286_v45, 2.0 }
 0x1c7   :  { %v297_v48 = vmul.f32 1.442695, %v288_v47  ;;  %v293_v54 = vsel %vm292_vm3, %v288_v47, %v280_v43 }
 0x1c8   :  { %v281_v49 = vpop.f32.mrf.mxu2 }
 0x1c9   :  { %441 = vpow2.f32 %v297_v48  ;;  %v282_v50 = vadd.f32 %v440_v41, %v281_v49 }
 0x1cb   :  { %v287_v51 = vmax.f32 %v282_v50, -20.0 }
 0x1cd   :  { %v289_v52 = vmin.f32 %v287_v51, 2.0 }
 0x1cf   :  { %v442_v53 = vpop.eup %441  ;;  %v299_v55 = vmul.f32 1.442695, %v289_v52  ;;  %v294_v58 = vsel %vm292_vm3, %v289_v52, %v282_v50 }
 0x1d0   :  { %v301_v56 = vsel %vm296_vm4, %v442_v53, %v293_v54 }
 0x1d1   :  { %303 = vst [vmem:[%s518_s3] sm:$0xff] %v301_v56  ;;  %443 = vpow2.f32 %v299_v55 }
 0x1d7   :  { %v444_v57 = vpop.eup %443 }
 0x1d8   :  { %v302_v59 = vsel %vm296_vm4, %v444_v57, %v294_v58 }
 0x1d9   :  { %304 = vst [vmem:[%s518_s3 + $0x8] sm:$0xff] %v302_v59 }
 0x1da   :  { %309 = vsyncpa [#allocation3], 1 }

</bundles_post_ra>
